<compile_context>
chip_gen: v6e
topology: v6e:2x2x1
jax: 0.10.0
libtpu: 0.0.40
codegen_flags: <defaults>
</compile_context>

<pallas_src>
import math

import jax
import jax.numpy as jnp
from jax.experimental import pallas as pl
from jax.experimental.pallas import tpu as pltpu


def _pe_kernel(pos_ref, grp_ref, div_ref, phase_ref, out_ref):
    """Sinusoidal positional encoding on a lane-dense folded layout.

    pos_ref:   (tile_r, F)  float32 -- F consecutive positions per output row
    grp_ref:   (1, W)       int32   -- lane -> which of the F positions it uses
    div_ref:   (1, W)       float32 -- tiled div_term (exp(-ln(1e4)*2i/D))
    phase_ref: (1, W)       float32 -- 0 for even columns, pi/2 for odd columns
    out_ref:   (tile_r, W)  float32 -- W = F * D, lane-dense output slab
    """
    f = pos_ref.shape[-1]
    pos = pos_ref[...]                                     # (tile_r, F)
    grp = grp_ref[...]                                     # (1, W)

    # Broadcast each of the F positions across its D-lane group via a short
    # static chain of lane-wise selects (no cross-lane gather, no MXU).
    acc = jnp.broadcast_to(pos[:, 0:1], out_ref.shape)     # (tile_r, W)
    for k in range(1, f):
        acc = jnp.where(grp == k, pos[:, k:k + 1], acc)

    # Single EUP transcendental: sin(angle) for even cols, cos == sin(+pi/2).
    out_ref[...] = jnp.sin(acc * div_ref[...] + phase_ref[...])


def positional_encoding(x, embed_dim):
    """JAX/Pallas equivalent of PositionalEncoding.forward.

    Args:
        x: (B, T) array of timestep positions (any float/int dtype).
        embed_dim: even embedding dimension D.
    Returns:
        (B, T, embed_dim) float32 positional encodings (matches PyTorch module).
    """
    assert embed_dim % 2 == 0, "embed_dim must be even"
    b, t = x.shape
    n = b * t
    d = embed_dim

    # ---- column-constant tables, hoisted out of the kernel -------------------
    j = jnp.arange(d)
    i2 = ((j // 2) * 2).astype(jnp.float32)
    div = jnp.exp(i2 * (-math.log(10000.0) / d))                   # (D,)
    phase = (j % 2).astype(jnp.float32) * (math.pi / 2.0)          # (D,)

    # ---- lane-dense folding: F consecutive positions per 128-wide row -------
    if d < 128 and 128 % d == 0 and n % (128 // d) == 0:
        f = 128 // d
    else:
        f = 1  # D >= 128 is already lane-dense; odd cases fall back unfolded
    w = f * d
    rows = n // f

    pos = x.astype(jnp.float32).reshape(rows, f)                   # (rows, F)
    div_w = jnp.tile(div, (f,))[None, :]                           # (1, W)
    phase_w = jnp.tile(phase, (f,))[None, :]                       # (1, W)
    grp_w = (jnp.arange(w, dtype=jnp.int32) // d)[None, :]         # (1, W)

    # ---- tile sizing: ~2 MiB of output per grid step, 8-row aligned ---------
    bytes_per_row = w * 4
    tile_r = max(8, (2 * 1024 * 1024) // bytes_per_row)
    tile_r = max(8, (tile_r // 8) * 8)
    if tile_r >= rows:
        tile_r = rows            # single full block; no ragged handling needed
    grid = (pl.cdiv(rows, tile_r),)

    out = pl.pallas_call(
        _pe_kernel,
        out_shape=jax.ShapeDtypeStruct((rows, w), jnp.float32),
        grid_spec=pltpu.PrefetchScalarGridSpec(
            num_scalar_prefetch=0,
            grid=grid,
            in_specs=[
                pl.BlockSpec((tile_r, f), lambda i: (i, 0)),
                pl.BlockSpec((1, w), lambda i: (0, 0)),   # constant: DMA'd once
                pl.BlockSpec((1, w), lambda i: (0, 0)),
                pl.BlockSpec((1, w), lambda i: (0, 0)),
            ],
            out_specs=pl.BlockSpec((tile_r, w), lambda i: (i, 0)),
        ),
        compiler_params=pltpu.CompilerParams(
            dimension_semantics=("parallel",),      # shards grid over 2 TCs (v7x)
            vmem_limit_bytes=32 * 1024 * 1024,      # explicit; safe on v7x 64 MiB
        ),
    )(pos, grp_w, div_w, phase_w)

    # (rows, W) and (B, T, D) share the same row-major flat ordering -> free.
    return out.reshape(b, t, d)


def _reference(x, embed_dim):
    """Pure-JAX reference mirroring the PyTorch module exactly."""
    bsz, seq = x.shape
    pos = x.astype(jnp.float32)[..., None]                         # (B, T, 1)
    i2 = jnp.arange(0, embed_dim, 2, dtype=jnp.float32)            # (D/2,)
    div = jnp.exp(i2 * (-math.log(10000.0) / embed_dim))           # (D/2,)
    pe = jnp.zeros((bsz, seq, embed_dim), jnp.float32)
    pe = pe.at[:, :, 0::2].set(jnp.sin(pos * div))
    pe = pe.at[:, :, 1::2].set(jnp.cos(pos * div))
    return pe


if __name__ == "__main__":
    key = jax.random.PRNGKey(0)

    # Primary config matching the module's usage: timesteps (B, T) -> (B, T, D).
    B, T, D = 2, 8, 32
    x = jax.random.randint(key, (B, T), 0, 100).astype(jnp.float32)

    out = jax.block_until_ready(positional_encoding(x, D))
    ref = _reference(x, D)
    assert out.shape == (B, T, D), out.shape
    assert jnp.allclose(out, ref, atol=1e-5, rtol=1e-5), "mismatch vs reference (D=32)"

    # Second config exercising the natively lane-dense (no-fold) path.
    D2 = 128
    out2 = jax.block_until_ready(positional_encoding(x, D2))
    ref2 = _reference(x, D2)
    assert out2.shape == (B, T, D2), out2.shape
    assert jnp.allclose(out2, ref2, atol=1e-5, rtol=1e-5), "mismatch vs reference (D=128)"

    print("KERNEL_OK")
</pallas_src>

<mosaic_0001>
module attributes {stable_mosaic.version = 11 : i64} {
  func.func @_pe_kernel(%arg0: i32, %arg1: memref<4x4xf32, #tpu.memory_space<vmem>>, %arg2: memref<1x128xi32, #tpu.memory_space<vmem>>, %arg3: memref<1x128xf32, #tpu.memory_space<vmem>>, %arg4: memref<1x128xf32, #tpu.memory_space<vmem>>, %arg5: memref<4x128xf32, #tpu.memory_space<vmem>>) attributes {dimension_semantics = [#tpu.dimension_semantics<parallel>], iteration_bounds = array<i64: 1>, scalar_prefetch = 0 : i64, scratch_operands = 0 : i64, tpu.core_type = #tpu.core_type<tc>, window_params = [{transform_indices = @transform_0, window_bounds = array<i64: 4, 4>}, {pipeline_mode = #tpu.pipeline_mode<synchronous>, transform_indices = @transform_1, window_bounds = array<i64: 1, 128>}, {pipeline_mode = #tpu.pipeline_mode<synchronous>, transform_indices = @transform_2, window_bounds = array<i64: 1, 128>}, {pipeline_mode = #tpu.pipeline_mode<synchronous>, transform_indices = @transform_3, window_bounds = array<i64: 1, 128>}, {transform_indices = @transform_4, window_bounds = array<i64: 4, 128>}]} {
    %c0 = arith.constant 0 : index
    %c0_0 = arith.constant 0 : index
    %0 = vector.load %arg1[%c0, %c0_0] : memref<4x4xf32, #tpu.memory_space<vmem>>, vector<4x4xf32>
    %c0_1 = arith.constant 0 : index
    %c0_2 = arith.constant 0 : index
    %1 = vector.load %arg2[%c0_1, %c0_2] : memref<1x128xi32, #tpu.memory_space<vmem>>, vector<1x128xi32>
    %2 = vector.extract_strided_slice %0 {offsets = [0, 0], sizes = [4, 1], strides = [1, 1]} : vector<4x4xf32> to vector<4x1xf32>
    %3 = vector.shape_cast %2 : vector<4x1xf32> to vector<4x1xf32>
    %4 = vector.broadcast %3 : vector<4x1xf32> to vector<4x128xf32>
    %c1_i32 = arith.constant 1 : i32
    %5 = vector.broadcast %c1_i32 : i32 to vector<1x128xi32>
    %6 = arith.cmpi eq, %1, %5 : vector<1x128xi32>
    %7 = vector.extract_strided_slice %0 {offsets = [0, 1], sizes = [4, 1], strides = [1, 1]} : vector<4x4xf32> to vector<4x1xf32>
    %8 = vector.shape_cast %6 : vector<1x128xi1> to vector<1x128xi1>
    %9 = vector.broadcast %8 : vector<1x128xi1> to vector<4x128xi1>
    %10 = vector.shape_cast %7 : vector<4x1xf32> to vector<4x1xf32>
    %11 = vector.broadcast %10 : vector<4x1xf32> to vector<4x128xf32>
    %12 = arith.select %9, %11, %4 : vector<4x128xi1>, vector<4x128xf32>
    %c2_i32 = arith.constant 2 : i32
    %13 = vector.broadcast %c2_i32 : i32 to vector<1x128xi32>
    %14 = arith.cmpi eq, %1, %13 : vector<1x128xi32>
    %15 = vector.extract_strided_slice %0 {offsets = [0, 2], sizes = [4, 1], strides = [1, 1]} : vector<4x4xf32> to vector<4x1xf32>
    %16 = vector.shape_cast %14 : vector<1x128xi1> to vector<1x128xi1>
    %17 = vector.broadcast %16 : vector<1x128xi1> to vector<4x128xi1>
    %18 = vector.shape_cast %15 : vector<4x1xf32> to vector<4x1xf32>
    %19 = vector.broadcast %18 : vector<4x1xf32> to vector<4x128xf32>
    %20 = arith.select %17, %19, %12 : vector<4x128xi1>, vector<4x128xf32>
    %c3_i32 = arith.constant 3 : i32
    %21 = vector.broadcast %c3_i32 : i32 to vector<1x128xi32>
    %22 = arith.cmpi eq, %1, %21 : vector<1x128xi32>
    %23 = vector.extract_strided_slice %0 {offsets = [0, 3], sizes = [4, 1], strides = [1, 1]} : vector<4x4xf32> to vector<4x1xf32>
    %24 = vector.shape_cast %22 : vector<1x128xi1> to vector<1x128xi1>
    %25 = vector.broadcast %24 : vector<1x128xi1> to vector<4x128xi1>
    %26 = vector.shape_cast %23 : vector<4x1xf32> to vector<4x1xf32>
    %27 = vector.broadcast %26 : vector<4x1xf32> to vector<4x128xf32>
    %28 = arith.select %25, %27, %20 : vector<4x128xi1>, vector<4x128xf32>
    %c0_3 = arith.constant 0 : index
    %c0_4 = arith.constant 0 : index
    %29 = vector.load %arg3[%c0_3, %c0_4] : memref<1x128xf32, #tpu.memory_space<vmem>>, vector<1x128xf32>
    %30 = vector.broadcast %29 : vector<1x128xf32> to vector<4x128xf32>
    %31 = arith.mulf %28, %30 : vector<4x128xf32>
    %c0_5 = arith.constant 0 : index
    %c0_6 = arith.constant 0 : index
    %32 = vector.load %arg4[%c0_5, %c0_6] : memref<1x128xf32, #tpu.memory_space<vmem>>, vector<1x128xf32>
    %33 = vector.broadcast %32 : vector<1x128xf32> to vector<4x128xf32>
    %34 = arith.addf %31, %33 : vector<4x128xf32>
    %35 = math.sin %34 : vector<4x128xf32>
    %c0_7 = arith.constant 0 : index
    %c0_8 = arith.constant 0 : index
    %36 = vector.load %arg5[%c0_7, %c0_8] : memref<4x128xf32, #tpu.memory_space<vmem>>, vector<4x128xf32>
    tpu.vector_store %arg5[%c0_7, %c0_8], %35 {strides = array<i32>} : memref<4x128xf32, #tpu.memory_space<vmem>>, vector<4x128xf32>,
    return
  }
  func.func @transform_0(%arg0: i32) -> (i32, i32) {
    %c0_i32 = arith.constant 0 : i32
    %c0_i32_0 = arith.constant 0 : i32
    return %arg0, %c0_i32 : i32, i32
  }
  func.func @transform_1(%arg0: i32) -> (i32, i32) {
    %c0_i32 = arith.constant 0 : i32
    %c0_i32_0 = arith.constant 0 : i32
    %c0_i32_1 = arith.constant 0 : i32
    return %c0_i32, %c0_i32_0 : i32, i32
  }
  func.func @transform_2(%arg0: i32) -> (i32, i32) {
    %c0_i32 = arith.constant 0 : i32
    %c0_i32_0 = arith.constant 0 : i32
    %c0_i32_1 = arith.constant 0 : i32
    return %c0_i32, %c0_i32_0 : i32, i32
  }
  func.func @transform_3(%arg0: i32) -> (i32, i32) {
    %c0_i32 = arith.constant 0 : i32
    %c0_i32_0 = arith.constant 0 : i32
    %c0_i32_1 = arith.constant 0 : i32
    return %c0_i32, %c0_i32_0 : i32, i32
  }
  func.func @transform_4(%arg0: i32) -> (i32, i32) {
    %c0_i32 = arith.constant 0 : i32
    %c0_i32_0 = arith.constant 0 : i32
    return %arg0, %c0_i32 : i32, i32
  }
}

</mosaic_0001>

<bundles_post_ra>
// kernel: tpu_custom_call.1
= control target key start
LH: loop header
LB: loop body
LE: loop exit
PB: predicated region body
PF: predicated region fallthrough
CT: control target
= control target key end

     0   :  { %9 = vsyncpa [#allocation3], 0  ;;  %s357_s0 = inlined_call_operand.hbm [shape: f32[4,4], index: 0, kind: input, shape index: {}]   ;;  %s358_s1 = inlined_call_operand.vmem [shape: s32[1,128], index: 1, kind: input, shape index: {}]   ;;  %s359_s2 = inlined_call_operand.vmem [shape: f32[1,128], index: 2, kind: input, shape index: {}]   ;;  %s360_s3 = inlined_call_operand.vmem [shape: f32[1,128], index: 3, kind: input, shape index: {}]   ;;  %s361_s4 = inlined_call_operand.hbm [shape: f32[4,128], index: 4, kind: output, shape index: {}]  }
   0x1   :  { %10 = vsyncpa [#allocation4], 0  ;;  %s284_s15 = smov [#allocation2]  }
   0x2   :  { %s17_s16 = sshll.u32 %s284_s15, 4  ;;  %s18_s16 = int_to_ptr.vmem [resolvable:$true] %s17_s16 }
   0x3   :  { %s248_s17 = scalar_lea.vmem %s18_s16, 64  ;;  %p253_p1 = scmp.lt.s32.totalorder %s18_s16, %s18_s16 }
   0x4   :  { %p249_p0 = scmp.ne.s32.totalorder %s18_s16, %s248_s17  ;;  %p254_p2 = scmp.lt.s32.totalorder %s248_s17, %s248_s17 }
   0x6   :  { %p255_p3 = por %p254_p2, %p253_p1 }
   0x8   :  { %p256_p4 = pnand %p255_p3, %p249_p0 }
   0xa   :  { %259 = shalt.err (!%p256_p4)
}
   0xb   :  { %20 = dma.hbm_to_vmem [thread:$0]  %s357_s0, 64, %s18_s16, [#allocation3]  }
   0xc   :  { %280 = dma.done.wait [#allocation3], 64  }
   0xd   :  { %281 = vsyncadd [#allocation3], 4294967232  ;;  %v285_v0 = vmov 0   ;;  %v286_v1 = vmov 2   ;;  %v30_v2 = vld [vmem:[#allocation2] sm:$0xf]  ;;  %v39_v5 = vlaneseq }
   0xe   :  { %231 = vset.pattern.permute.xlu0 %v285_v0  ;;  %233 = vset.pattern.permute.xlu1 %v286_v1  ;;  %v287_v3 = vmov 1   ;;  %v288_v4 = vmov 3   ;;  %v31_v6 = vld [vmem:[%s358_s1] sm:$0x1]  ;;  %v289_v36 = vmov 683565275  }
   0xf   :  { %34 = vperm.xlu0 %231, %v30_v2   ;;  %57 = vperm.xlu1 %233, %v30_v2   ;;  %v40_v7 = vshrl.u32 %v39_v5, 7  ;;  %vm37_vm0 = vcmp.eq.s32.totalorder %v31_v6, 1  ;;  %vm49_vm1 = vcmp.eq.s32.totalorder %v31_v6, 2  ;;  %vm61_vm2 = vcmp.eq.s32.totalorder %v31_v6, 3  ;;  %v209_v20 = vld [vmem:[%s359_s2] ss:$0 sm:$0xff] }
  0x10   :  { %v38_v9 = vsel %vm37_vm0, 1, %v285_v0  ;;  %v50_v10 = vsel %vm49_vm1, 1, %v285_v0  ;;  %v62_v11 = vsel %vm61_vm2, 1, %v285_v0  ;;  %v210_v22 = vld [vmem:[%s360_s3] ss:$0 sm:$0xff]  ;;  %s295_s2 = smov [#allocation5]  }
  0x11   :  { %v41_v8 = vsub.s32 0, %v40_v7  ;;  %v290_v38 = vmov 2475754826   ;;  %v291_v41 = vmov 2131351028   ;;  %s200_s3 = sshll.u32 %s295_s2, 4  ;;  %s201_s3 = int_to_ptr.vmem [resolvable:$true] %s200_s3 }
  0x12   :  { %v292_v44 = vmov 2102212464   ;;  %v293_v47 = vmov 920167782   ;;  %v294_v50 = vmov 1326507024   ;;  %p265_p6 = scmp.lt.s32.totalorder %s201_s3, %s201_s3 }
  0x13   :  { %232 = vset.pattern.permute.xlu0 %v287_v3  ;;  %234 = vset.pattern.permute.xlu1 %v288_v4  ;;  %v42_v12 = vrot.slane %v38_v9, %v41_v8  ;;  %v54_v15 = vrot.slane %v50_v10, %v41_v8  ;;  %v66_v16 = vrot.slane %v62_v11, %v41_v8  ;;  %s260_s24 = scalar_lea.vmem %s201_s3, 64 }
  0x14   :  { %45 = vperm.xlu0 %232, %v30_v2   ;;  %69 = vperm.xlu1 %234, %v30_v2   ;;  %p261_p5 = scmp.ne.s32.totalorder %s201_s3, %s260_s24  ;;  %p266_p7 = scmp.lt.s32.totalorder %s260_s24, %s260_s24 }
  0x15   :  { %vm43_vm3 = vcmp.eq.s32.totalorder %v42_v12, 1  ;;  %vm55_vm4 = vcmp.eq.s32.totalorder %v54_v15, 1  ;;  %vm67_vm5 = vcmp.eq.s32.totalorder %v66_v16, 1 }
  0x16   :  { %p267_p8 = por %p266_p7, %p265_p6 }
  0x18   :  { %235 = vset.pattern.permute.xlu0 %v288_v4  ;;  %p268_p9 = pnand %p267_p8, %p261_p5 }
  0x8a   :  { %v35_v13 = vpop.permute.xlu0 %34  ;;  %v58_v14 = vpop.permute.xlu1 %57 }
  0x8f   :  { %v46_v17 = vpop.permute.xlu0 %45  ;;  %v70_v18 = vpop.permute.xlu1 %69 }
  0x90   :  { %v48_v19 = vsel %vm43_vm3, %v46_v17, %v35_v13 }
  0x91   :  { %v60_v21 = vsel %vm55_vm4, %v58_v14, %v48_v19 }
  0x92   :  { %v72_v23 = vsel %vm67_vm5, %v70_v18, %v60_v21 }
  0x93   :  { %v80_v24 = vmul.f32 %v209_v20, %v72_v23 }
  0x95   :  { %v333_v25 = vadd.f32 %v210_v22, %v80_v24 }
  0x97   :  { %v92_v26 = vand.u32 2139095040, %v333_v25  ;;  %v89_v30 = vand.u32 2147483647, %v333_v25  ;;  %vm91_vm13 = vcmp.lt.s32.totalorder %v333_v25, 0  ;;  %vm181_vm2 = vweird.f32 %v333_v25 }
  0x99   :  { %v93_v27 = vshrl.u32 %v92_v26, 23  ;;  %v96_v34 = vand.u32 8388607, %v89_v30  ;;  %vm90_vm14 = vcmp.le.f32.partialorder %v89_v30, 0.7853982 }
  0x9b   :  { %v211_v28 = vadd.s32 4294967169, %v93_v27  ;;  %v97_v52 = vor.u32 8388608, %v96_v34 }
  0x9d   :  { %v99_v29 = vadd.s32 1, %v211_v28  ;;  %v137_v2 = vshll.u32 %v97_v52, 8 }
  0x9f   :  { %vm100_vm6 = vcmp.gt.s32.totalorder %v99_v29, 0 }
  0xa0   :  { %v101_v31 = vsel %vm100_vm6, %v99_v29, 0 }
  0xa1   :  { %v103_v32 = vand.u32 31, %v101_v31  ;;  %v102_v35 = vshrl.u32 %v101_v31, 5 }
  0xa3   :  { %v104_v33 = vsub.s32 32, %v103_v32  ;;  %v106_v37 = vshll.u32 %v289_v36, %v103_v32  ;;  %v109_v39 = vshll.u32 %v290_v38, %v103_v32  ;;  %v112_v43 = vshll.u32 %v291_v41, %v103_v32 }
  0xa4   :  { %v115_v46 = vshll.u32 %v292_v44, %v103_v32  ;;  %v118_v49 = vshll.u32 %v293_v47, %v103_v32  ;;  %vm121_vm7 = vcmp.lt.s32.totalorder %v102_v35, 1  ;;  %vm124_vm8 = vcmp.lt.s32.totalorder %v102_v35, 4 }
  0xa5   :  { %v107_v40 = vshrl.u32 %v290_v38, %v104_v33  ;;  %v110_v42 = vshrl.u32 %v291_v41, %v104_v33  ;;  %v113_v45 = vshrl.u32 %v292_v44, %v104_v33  ;;  %v116_v48 = vshrl.u32 %v293_v47, %v104_v33 }
  0xa6   :  { %v119_v51 = vshrl.u32 %v294_v50, %v104_v33  ;;  %v105_v61 = vshrl.u32 %v289_v36, %v104_v33  ;;  %vm123_vm9 = vcmp.lt.s32.totalorder %v102_v35, 3  ;;  %vm122_vm10 = vcmp.lt.s32.totalorder %v102_v35, 2 }
  0xa7   :  { %v108_v53 = vor.u32 %v107_v40, %v106_v37  ;;  %v111_v54 = vor.u32 %v110_v42, %v109_v39  ;;  %v114_v55 = vor.u32 %v113_v45, %v112_v43  ;;  %v117_v56 = vor.u32 %v116_v48, %v115_v46 }
  0xa8   :  { %v120_v57 = vor.u32 %v119_v51, %v118_v49 }
  0xa9   :  { %v126_v58 = vsel %vm124_vm8, %v114_v55, 2102212464  ;;  %v129_v59 = vsel %vm121_vm7, %v108_v53, %v111_v54  ;;  %v133_v60 = vsel %vm121_vm7, %v111_v54, %v114_v55  ;;  %v130_v62 = vsel %vm124_vm8, %v117_v56, 920167782 }
  0xaa   :  { %v134_v63 = vsel %vm124_vm8, %v120_v57, 1326507024  ;;  %v131_v0 = vsel %vm123_vm9, %v114_v55, %v130_v62  ;;  %v125_v3 = vsel %vm121_vm7, %v105_v61, %v108_v53  ;;  %v127_v4 = vsel %vm123_vm9, %v111_v54, %v126_v58 }
  0xab   :  { %v135_v1 = vsel %vm123_vm9, %v117_v56, %v134_v63  ;;  %v132_v5 = vsel %vm122_vm10, %v129_v59, %v131_v0  ;;  %v128_v11 = vsel %vm122_vm10, %v125_v3, %v127_v4 }
  0xac   :  { %v136_v6 = vsel %vm122_vm10, %v133_v60, %v135_v1  ;;  %v342_v9 = vmul.u32.u64.low %v137_v2, %v132_v5  ;;  %v343_v10 = vmul.u32.u64.high %v137_v2, %v132_v5, %v342_v9  ;;  %v144_v13 = vmul.u32 %v137_v2, %v128_v11 }
  0xad   :  { %v339_v7 = vmul.u32.u64.low %v137_v2, %v136_v6  ;;  %v340_v8 = vmul.u32.u64.high %v137_v2, %v136_v6, %v339_v7 }
  0xae   :  { %v147_v12 = vadd.s32 1, %v343_v10 }
  0xaf   :  { %vm146_vm11 = vc.u32 %v340_v8, %v342_v9  ;;  %v145_v26 = vadd.s32 %v342_v9, %v340_v8 }
  0xb0   :  { %v148_v14 = vsel %vm146_vm11, %v147_v12, %v343_v10 }
  0xb1   :  { %v149_v15 = vadd.s32 %v148_v14, %v144_v13 }
  0xb3   :  { %v150_v16 = vadd.s32 536870912, %v149_v15 }
  0xb5   :  { %v151_v17 = vshrl.u32 %v150_v16, 30 }
  0xb7   :  { %v152_v18 = vshll.u32 %v151_v17, 30  ;;  %v175_v40 = vsub.s32 4, %v151_v17 }
  0xb9   :  { %v153_v19 = vsub.s32 %v149_v15, %v152_v18  ;;  %v176_v43 = vsel %vm91_vm13, %v175_v40, %v151_v17 }
  0xba   :  { %v178_v44 = vsel %vm90_vm14, 0, %v176_v43 }
  0xbb   :  { %v155_v20 = vsub.s32 0, %v153_v19  ;;  %v182_v45 = vadd.s32 3, %v178_v44 }
  0xbd   :  { %v212_v21 = vmin.u32 %v155_v20, %v153_v19  ;;  %v183_v46 = vand.u32 3, %v182_v45 }
  0xbf   :  { %v157_v22 = vclz %v212_v21  ;;  %vm188_vm15 = vcmp.eq.s32.totalorder %v183_v46, 2  ;;  %vm185_vm0 = vcmp.eq.s32.totalorder %v183_v46, 0  ;;  %vm184_vm1 = vcmp.lt.s32.totalorder %v183_v46, 2 }
  0xc1   :  { %v213_v23 = vadd.s32 4294967294, %v157_v22 }
  0xc3   :  { %vm214_vm12 = vcmp.lt.s32.totalorder %v213_v23, 0 }
  0xc4   :  { %v160_v24 = vsel %vm214_vm12, 0, %v213_v23 }
  0xc5   :  { %v161_v27 = vsub.s32 32, %v160_v24  ;;  %v165_v28 = vsub.s32 4294967266, %v160_v24  ;;  %v162_v29 = vshll.u32 %v153_v19, %v160_v24 }
  0xc7   :  { %v163_v31 = vshrl.u32 %v145_v26, %v161_v27  ;;  %v166_v32 = vadd.s32 127, %v165_v28 }
  0xc9   :  { %v164_v33 = vor.u32 %v163_v31, %v162_v29  ;;  %v167_v34 = vshll.u32 %v166_v32, 23 }
  0xcb   :  { %v168_v35 = vor.u32 4788187, %v167_v34  ;;  %v171_v37 = vcvt.s32.f32 %v164_v33 }
  0xcd   :  { %v169_v36 = vand.u32 2147483647, %v168_v35 }
  0xcf   :  { %v172_v38 = vmul.f32 %v171_v37, %v169_v36 }
  0xd1   :  { %v173_v39 = vxor.u32 2147483648, %v172_v38 }
  0xd3   :  { %v174_v41 = vsel %vm91_vm13, %v173_v39, %v172_v38 }
  0xd4   :  { %v177_v42 = vsel %vm90_vm14, %v333_v25, %v174_v41 }
  0xd5   :  { %236 = vcosq.f32 %v177_v42 }
  0xd6   :  { %238 = vsinq.f32 %v177_v42 }
  0xe2   :  { %v237_v47 = vpop.eup %236 }
  0xe3   :  { %v239_v48 = vpop.eup %238  ;;  %v189_v49 = vxor.u32 2147483648, %v237_v47 }
  0xe4   :  { %v186_v50 = vxor.u32 2147483648, %v239_v48 }
  0xe5   :  { %v190_v51 = vsel %vm188_vm15, %v189_v49, %v239_v48 }
  0xe6   :  { %v187_v30 = vsel %vm185_vm0, %v237_v47, %v186_v50 }
  0xe7   :  { %v191_v52 = vsel %vm184_vm1, %v187_v30, %v190_v51 }
  0xe8   :  { %v192_v53 = vsel %vm181_vm2, nan, %v191_v52 }
  0xe9   :  { %193 = vst [vmem:[#allocation5] sm:$0xf] %v192_v53 }
  0xea   :  { %271 = shalt.err (!%p268_p9)
}
  0xeb   :  { %203 = dma.vmem_to_hbm [thread:$0]  %s201_s3, 64, %s361_s4, [#allocation4]  }
  0xec   :  { %282 = dma.done.wait [#allocation4], 64  }
  0xed   :  { %283 = vsyncadd [#allocation4], 4294967232 }
  0xee   :  { %207 = vsyncpa [#allocation3], 1 }
  0xef   :  { %208 = vsyncpa [#allocation4], 1 }

</bundles_post_ra>
